<compile_context>
chip_gen: v6e
topology: v6e:2x2x1
jax: 0.10.0
libtpu: 0.0.40
codegen_flags: <defaults>
</compile_context>

<pallas_src>
import functools

import jax
import jax.numpy as jnp
from jax import lax
from jax.experimental import pallas as pl
from jax.experimental.pallas import tpu as pltpu


def _mlp_head_kernel(x_ref, g_ref, bta_ref, w_ref, b_ref, o_ref, *, eps, mm_dtype):
    # x_ref:   (TB, d)      CLS-token rows (zero-padded rows are harmless)
    # g_ref:   (1, d)       LayerNorm gamma
    # bta_ref: (1, d)       LayerNorm beta
    # w_ref:   (TN, d)      Linear weight tile (row-major, NOT transposed), mm_dtype
    # b_ref:   (1, TN)      Linear bias tile (f32, lane-padded)
    # o_ref:   (TB, TN)
    x = x_ref[...].astype(jnp.float32)
    d = x.shape[-1]

    # Fused one-pass LayerNorm statistics (biased variance, like torch.nn.LayerNorm).
    s1 = jnp.sum(x, axis=-1, keepdims=True)
    s2 = jnp.sum(x * x, axis=-1, keepdims=True)
    mu = s1 * (1.0 / d)
    var = jnp.maximum(s2 * (1.0 / d) - mu * mu, 0.0)
    inv = lax.rsqrt(var + eps)
    y = (x - mu) * inv * g_ref[...].astype(jnp.float32) + bta_ref[...].astype(jnp.float32)

    # Single MXU matmul for this (batch tile, class tile); transposed-RHS
    # contraction (y[TB,d] . w[TN,d]^T) is native on the MXU — no transpose needed.
    y_mm = y.astype(mm_dtype)
    out = lax.dot_general(
        y_mm, w_ref[...],
        dimension_numbers=(((1,), (1,)), ((), ())),
        preferred_element_type=jnp.float32,
    )
    out = out + b_ref[...].astype(jnp.float32)
    o_ref[...] = out.astype(o_ref.dtype)


def _cdiv(a, b):
    return -(-a // b)


def _round_up(n, m):
    return ((n + m - 1) // m) * m


def mlp_head(inputs, gamma, beta, weight, bias, *, eps=1e-5, matmul_dtype=None):
    """inputs: [B, N, d]; gamma/beta: [d]; weight: [C, d]; bias: [C] -> [B, C].

    matmul_dtype: dtype fed to the MXU (f32 accumulation always).  Defaults to
    bf16 if the activations are bf16, else f32 (bit-faithful to PyTorch).
    """
    B, _, d = inputs.shape
    C = weight.shape[0]
    if matmul_dtype is None:
        matmul_dtype = jnp.bfloat16 if inputs.dtype == jnp.bfloat16 else jnp.float32
    matmul_dtype = jnp.dtype(matmul_dtype)

    # ---- Tile selection -----------------------------------------------------
    # Balanced batch tiles (TB <= 512), >= 2 parallel steps when B > 8 so the
    # grid shards across both v7x TensorCores.
    TB_MAX = 512
    nb = _cdiv(B, TB_MAX)
    if nb == 1 and B > 8:
        nb = 2
    TB = _round_up(_cdiv(B, nb), 8)
    B_pad = nb * TB

    # Lane-dense, optionally tiled output columns (keeps the resident weight
    # block VMEM-friendly for very large heads).
    TN_MAX = 1024
    C_pad_min = _round_up(C, 128)
    nc = _cdiv(C_pad_min, TN_MAX)
    TN = _round_up(_cdiv(C_pad_min, nc), 128)
    C_pad = nc * TN

    # ---- Wrapper-side data prep (CLS rows only; no weight transpose) --------
    x = inputs[:, 0, :]                                    # [B, d] CLS token
    if B_pad != B:
        x = jnp.pad(x, ((0, B_pad - B), (0, 0)))           # zero rows are inert

    w_p = jnp.zeros((C_pad, d), matmul_dtype).at[:C, :].set(weight.astype(matmul_dtype))
    b_p = jnp.zeros((1, C_pad), jnp.float32).at[:, :C].set(bias.astype(jnp.float32))
    g_p = gamma.reshape(1, d)
    bta_p = beta.reshape(1, d)

    # ---- VMEM budget (double-buffered blocks); only override when needed ----
    in_bytes = jnp.dtype(inputs.dtype).itemsize
    est = 2 * (TB * d * in_bytes + TN * d * matmul_dtype.itemsize + TB * TN * in_bytes)
    est += 2 * (2 * d * 4 + TN * 4)                        # gamma/beta/bias blocks
    vmem_limit = None
    if est > 12 * 1024 * 1024:                             # v5e default scoped = 16 MiB
        vmem_limit = min(int(est * 3 // 2) + (2 << 20), 128 * 1024 * 1024)

    grid = (nb, nc)
    out = pl.pallas_call(
        functools.partial(_mlp_head_kernel, eps=eps, mm_dtype=matmul_dtype),
        out_shape=jax.ShapeDtypeStruct((B_pad, C_pad), inputs.dtype),
        grid_spec=pltpu.PrefetchScalarGridSpec(
            num_scalar_prefetch=0,
            grid=grid,
            in_specs=[
                pl.BlockSpec((TB, d), lambda i, j: (i, 0)),    # x (resident over j)
                pl.BlockSpec((1, d), lambda i, j: (0, 0)),     # gamma
                pl.BlockSpec((1, d), lambda i, j: (0, 0)),     # beta
                pl.BlockSpec((TN, d), lambda i, j: (j, 0)),    # weight tile
                pl.BlockSpec((1, TN), lambda i, j: (0, j)),    # bias tile
            ],
            out_specs=pl.BlockSpec((TB, TN), lambda i, j: (i, j)),
        ),
        compiler_params=pltpu.CompilerParams(
            dimension_semantics=("parallel", "parallel"),
            vmem_limit_bytes=vmem_limit,
        ),
    )(x, g_p, bta_p, w_p, b_p)

    return out[:B, :C]


def _reference(inputs, gamma, beta, weight, bias, *, eps=1e-5):
    """Pure-JAX replica of the PyTorch forward (LayerNorm -> Linear on CLS)."""
    x = inputs[:, 0, :]
    mu = jnp.mean(x, axis=-1, keepdims=True)
    var = jnp.mean((x - mu) ** 2, axis=-1, keepdims=True)
    xn = (x - mu) / jnp.sqrt(var + eps)
    y = xn * gamma.reshape(1, -1) + beta.reshape(1, -1)
    return y @ weight.T + bias.reshape(1, -1)


def _make_case(key, B, N, d, C):
    k1, k2, k3, k4, k5 = jax.random.split(key, 5)
    inputs = jax.random.normal(k1, (B, N, d), dtype=jnp.float32)
    gamma = 1.0 + 0.1 * jax.random.normal(k2, (d,), dtype=jnp.float32)
    beta = 0.1 * jax.random.normal(k3, (d,), dtype=jnp.float32)
    bound = 1.0 / (d ** 0.5)                      # nn.Linear default init range
    weight = jax.random.uniform(k4, (C, d), jnp.float32, -bound, bound)
    bias = jax.random.uniform(k5, (C,), jnp.float32, -bound, bound)
    return inputs, gamma, beta, weight, bias


if __name__ == "__main__":
    key = jax.random.PRNGKey(0)
    k_a, k_b = jax.random.split(key)

    # Case 1: shapes consistent with the module: batch=2, seq=8, hidden d=32,
    # class_num=10 -> output [2, 10].  Single-tile grid, exact f32 MXU path.
    B, N, d, C = 2, 8, 32, 10
    inputs, gamma, beta, weight, bias = _make_case(k_a, B, N, d, C)
    out = jax.block_until_ready(mlp_head(inputs, gamma, beta, weight, bias,
                                         matmul_dtype=jnp.float32))
    ref = _reference(inputs, gamma, beta, weight, bias)
    assert out.shape == (B, C), out.shape
    assert jnp.allclose(out, ref, atol=1e-4, rtol=1e-4), "f32 mismatch vs reference"

    # Same case through the bf16-MXU fast path (f32 accumulation, looser tol).
    out_bf16 = jax.block_until_ready(mlp_head(inputs, gamma, beta, weight, bias,
                                              matmul_dtype=jnp.bfloat16))
    assert jnp.allclose(out_bf16, ref, atol=3e-2, rtol=3e-2), "bf16 mismatch vs reference"

    # Case 2: slightly larger, exercises the multi-tile (2-step parallel) grid.
    B2, N2, d2, C2 = 48, 4, 128, 200
    inputs2, gamma2, beta2, weight2, bias2 = _make_case(k_b, B2, N2, d2, C2)
    out2 = jax.block_until_ready(mlp_head(inputs2, gamma2, beta2, weight2, bias2,
                                          matmul_dtype=jnp.float32))
    ref2 = _reference(inputs2, gamma2, beta2, weight2, bias2)
    assert out2.shape == (B2, C2), out2.shape
    assert jnp.allclose(out2, ref2, atol=1e-4, rtol=1e-4), "multi-tile mismatch vs reference"

    print("KERNEL_OK")
</pallas_src>

<mosaic_0001>
module attributes {stable_mosaic.version = 11 : i64} {
  func.func @_mlp_head_kernel(%arg0: i32, %arg1: i32, %arg2: memref<8x32xf32, #tpu.memory_space<vmem>>, %arg3: memref<1x32xf32, #tpu.memory_space<vmem>>, %arg4: memref<1x32xf32, #tpu.memory_space<vmem>>, %arg5: memref<128x32xf32, #tpu.memory_space<vmem>>, %arg6: memref<1x128xf32, #tpu.memory_space<vmem>>, %arg7: memref<8x128xf32, #tpu.memory_space<vmem>>) attributes {dimension_semantics = [#tpu.dimension_semantics<parallel>, #tpu.dimension_semantics<parallel>], iteration_bounds = array<i64: 1, 1>, scalar_prefetch = 0 : i64, scratch_operands = 0 : i64, tpu.core_type = #tpu.core_type<tc>, window_params = [{transform_indices = @transform_0, window_bounds = array<i64: 8, 32>}, {pipeline_mode = #tpu.pipeline_mode<synchronous>, transform_indices = @transform_1, window_bounds = array<i64: 1, 32>}, {pipeline_mode = #tpu.pipeline_mode<synchronous>, transform_indices = @transform_2, window_bounds = array<i64: 1, 32>}, {transform_indices = @transform_3, window_bounds = array<i64: 128, 32>}, {transform_indices = @transform_4, window_bounds = array<i64: 1, 128>}, {transform_indices = @transform_5, window_bounds = array<i64: 8, 128>}]} {
    %c0 = arith.constant 0 : index
    %c0_0 = arith.constant 0 : index
    %0 = vector.load %arg2[%c0, %c0_0] : memref<8x32xf32, #tpu.memory_space<vmem>>, vector<8x32xf32>
    %cst = arith.constant dense<0.000000e+00> : vector<8xf32>
    %1 = vector.multi_reduction <add>, %0, %cst [1] : vector<8x32xf32> to vector<8xf32>
    %2 = vector.shape_cast %1 : vector<8xf32> to vector<8x1xf32>
    %3 = arith.mulf %0, %0 : vector<8x32xf32>
    %cst_1 = arith.constant dense<0.000000e+00> : vector<8xf32>
    %4 = vector.multi_reduction <add>, %3, %cst_1 [1] : vector<8x32xf32> to vector<8xf32>
    %5 = vector.shape_cast %4 : vector<8xf32> to vector<8x1xf32>
    %cst_2 = arith.constant 3.125000e-02 : f32
    %6 = vector.broadcast %cst_2 : f32 to vector<8x1xf32>
    %7 = arith.mulf %2, %6 : vector<8x1xf32>
    %cst_3 = arith.constant 3.125000e-02 : f32
    %8 = vector.broadcast %cst_3 : f32 to vector<8x1xf32>
    %9 = arith.mulf %5, %8 : vector<8x1xf32>
    %10 = arith.mulf %7, %7 : vector<8x1xf32>
    %11 = arith.subf %9, %10 : vector<8x1xf32>
    %cst_4 = arith.constant 0.000000e+00 : f32
    %12 = vector.broadcast %cst_4 : f32 to vector<8x1xf32>
    %13 = arith.maximumf %11, %12 : vector<8x1xf32>
    %cst_5 = arith.constant 9.99999974E-6 : f32
    %14 = vector.broadcast %cst_5 : f32 to vector<8x1xf32>
    %15 = arith.addf %13, %14 : vector<8x1xf32>
    %16 = math.rsqrt %15 : vector<8x1xf32>
    %17 = vector.broadcast %7 : vector<8x1xf32> to vector<8x32xf32>
    %18 = arith.subf %0, %17 : vector<8x32xf32>
    %19 = vector.broadcast %16 : vector<8x1xf32> to vector<8x32xf32>
    %20 = arith.mulf %18, %19 : vector<8x32xf32>
    %c0_6 = arith.constant 0 : index
    %c0_7 = arith.constant 0 : index
    %21 = vector.load %arg3[%c0_6, %c0_7] : memref<1x32xf32, #tpu.memory_space<vmem>>, vector<1x32xf32>
    %22 = vector.broadcast %21 : vector<1x32xf32> to vector<8x32xf32>
    %23 = arith.mulf %20, %22 : vector<8x32xf32>
    %c0_8 = arith.constant 0 : index
    %c0_9 = arith.constant 0 : index
    %24 = vector.load %arg4[%c0_8, %c0_9] : memref<1x32xf32, #tpu.memory_space<vmem>>, vector<1x32xf32>
    %25 = vector.broadcast %24 : vector<1x32xf32> to vector<8x32xf32>
    %26 = arith.addf %23, %25 : vector<8x32xf32>
    %c0_10 = arith.constant 0 : index
    %c0_11 = arith.constant 0 : index
    %27 = vector.load %arg5[%c0_10, %c0_11] : memref<128x32xf32, #tpu.memory_space<vmem>>, vector<128x32xf32>
    %cst_12 = arith.constant dense<0.000000e+00> : vector<8x128xf32>
    %28 = tpu.matmul %26, %27, %cst_12 {dimension_numbers = #tpu.dot_dimension_numbers<[1], [1], [0], [0], [0, 0, 1, 0], [], []>} : vector<8x32xf32>, vector<128x32xf32>, vector<8x128xf32> -> vector<8x128xf32>
    %c0_13 = arith.constant 0 : index
    %c0_14 = arith.constant 0 : index
    %29 = vector.load %arg6[%c0_13, %c0_14] : memref<1x128xf32, #tpu.memory_space<vmem>>, vector<1x128xf32>
    %30 = vector.broadcast %29 : vector<1x128xf32> to vector<8x128xf32>
    %31 = arith.addf %28, %30 : vector<8x128xf32>
    %c0_15 = arith.constant 0 : index
    %c0_16 = arith.constant 0 : index
    %32 = vector.load %arg7[%c0_15, %c0_16] : memref<8x128xf32, #tpu.memory_space<vmem>>, vector<8x128xf32>
    tpu.vector_store %arg7[%c0_15, %c0_16], %31 {strides = array<i32>} : memref<8x128xf32, #tpu.memory_space<vmem>>, vector<8x128xf32>,
    return
  }
  func.func @transform_0(%arg0: i32, %arg1: i32) -> (i32, i32) {
    %c0_i32 = arith.constant 0 : i32
    %c0_i32_0 = arith.constant 0 : i32
    return %arg0, %c0_i32 : i32, i32
  }
  func.func @transform_1(%arg0: i32, %arg1: i32) -> (i32, i32) {
    %c0_i32 = arith.constant 0 : i32
    %c0_i32_0 = arith.constant 0 : i32
    %c0_i32_1 = arith.constant 0 : i32
    return %c0_i32, %c0_i32_0 : i32, i32
  }
  func.func @transform_2(%arg0: i32, %arg1: i32) -> (i32, i32) {
    %c0_i32 = arith.constant 0 : i32
    %c0_i32_0 = arith.constant 0 : i32
    %c0_i32_1 = arith.constant 0 : i32
    return %c0_i32, %c0_i32_0 : i32, i32
  }
  func.func @transform_3(%arg0: i32, %arg1: i32) -> (i32, i32) {
    %c0_i32 = arith.constant 0 : i32
    %c0_i32_0 = arith.constant 0 : i32
    return %arg1, %c0_i32 : i32, i32
  }
  func.func @transform_4(%arg0: i32, %arg1: i32) -> (i32, i32) {
    %c0_i32 = arith.constant 0 : i32
    %c0_i32_0 = arith.constant 0 : i32
    return %c0_i32, %arg1 : i32, i32
  }
  func.func @transform_5(%arg0: i32, %arg1: i32) -> (i32, i32) {
    %c0_i32 = arith.constant 0 : i32
    return %arg0, %arg1 : i32, i32
  }
}

</mosaic_0001>

<bundles_post_ra>
// kernel: tpu_custom_call.1
= control target key start
LH: loop header
LB: loop body
LE: loop exit
PB: predicated region body
PF: predicated region fallthrough
CT: control target
= control target key end

     0   :  { %vm22_vm0 = vcmask 261120   ;;  %v313_v4 = vmov 0.0   ;;  %s434_s0 = inlined_call_operand.vmem [shape: f32[8,32], index: 0, kind: input, shape index: {}]   ;;  %s435_s1 = inlined_call_operand.vmem [shape: f32[1,32], index: 1, kind: input, shape index: {}]   ;;  %s436_s2 = inlined_call_operand.vmem [shape: f32[1,32], index: 2, kind: input, shape index: {}]   ;;  %s437_s3 = inlined_call_operand.vmem [shape: f32[128,32], index: 3, kind: input, shape index: {}]   ;;  %s438_s4 = inlined_call_operand.vmem [shape: f32[1,128], index: 4, kind: input, shape index: {}]   ;;  %s439_s5 = inlined_call_operand.hbm [shape: f32[8,128], index: 5, kind: output, shape index: {}]  }
   0x1   :  { %v349_v0 = vld [vmem:[%s434_s0] sm:$0xff]  ;;  %v70_v1 = vld [vmem:[%s437_s3 + $0x78] sm:$0xff]  ;;  %251 = vmatprep.subr.mxu0 %v313_v4  ;;  %v69_v6 = vld [vmem:[%s437_s3 + $0x70] sm:$0xff] }
   0x2   :  { %v23_v2 = vsel %vm22_vm0, %v349_v0, 0.0  ;;  %v26_v3 = vmul.f32 %v349_v0, %v349_v0  ;;  %252 = vmatpush3.xpose.msk.msra.mxu0 %vm22_vm0, %v70_v1 }
   0x3   :  { %24 = vadd.xlane.f32.xlu0 %v23_v2  ;;  %253 = vmatprep.subr.mxu0 %v313_v4 }
   0x4   :  { %v27_v5 = vsel %vm22_vm0, %v26_v3, 0.0 }
   0x5   :  { %10 = vsyncpa [#allocation3], 0  ;;  %v68_v7 = vld [vmem:[%s437_s3 + $0x68] sm:$0xff]  ;;  %v67_v8 = vld [vmem:[%s437_s3 + $0x60] sm:$0xff]  ;;  %vm314_vm1 = vmmov 0   ;;  %s315_s30 = smov [#allocation2]  }
   0x6   :  { %254 = vmatpush3.xpose.msk.msra.mxu0 %vm22_vm0, %v69_v6  ;;  %v66_v9 = vld [vmem:[%s437_s3 + $0x58] sm:$0xff]  ;;  %v65_v10 = vld [vmem:[%s437_s3 + $0x50] sm:$0xff]  ;;  %v64_v11 = vld [vmem:[%s437_s3 + $0x48] sm:$0xff]  ;;  %283 = vmatprep.mubr.msk.f32.mxu0 %vm314_vm1, %v313_v4  ;;  %s206_s6 = sshll.u32 %s315_s30, 4  ;;  %s207_s6 = int_to_ptr.vmem [resolvable:$true] %s206_s6 }
   0x7   :  { %28 = vadd.xlane.f32.xlu0 %v27_v5  ;;  %255 = vmatprep.subr.mxu0 %v313_v4  ;;  %v63_v12 = vld [vmem:[%s437_s3 + $0x40] sm:$0xff]  ;;  %v62_v13 = vld [vmem:[%s437_s3 + $0x38] sm:$0xff]  ;;  %v61_v14 = vld [vmem:[%s437_s3 + $0x30] sm:$0xff]  ;;  %p296_p1 = scmp.lt.s32.totalorder %s207_s6, %s207_s6 }
   0x8   :  { %v60_v15 = vld [vmem:[%s437_s3 + $0x28] sm:$0xff]  ;;  %v59_v16 = vld [vmem:[%s437_s3 + $0x20] sm:$0xff]  ;;  %v58_v17 = vld [vmem:[%s437_s3 + $0x18] sm:$0xff] }
   0x9   :  { %v57_v18 = vld [vmem:[%s437_s3 + $0x10] sm:$0xff]  ;;  %v56_v19 = vld [vmem:[%s437_s3 + $0x8] sm:$0xff]  ;;  %v55_v20 = vld [vmem:[%s437_s3] sm:$0xff] }
   0xa   :  { %256 = vmatpush3.xpose.msk.msra.mxu0 %vm22_vm0, %v68_v7  ;;  %v214_v31 = vld [vmem:[%s435_s1] ss:$0 sm:$0xff]  ;;  %s291_s1 = scalar_lea.vmem %s207_s6, 128 }
   0xb   :  { %257 = vmatprep.subr.mxu0 %v313_v4  ;;  %v215_v33 = vld [vmem:[%s436_s2] ss:$0 sm:$0xff]  ;;  %p292_p0 = scmp.ne.s32.totalorder %s207_s6, %s291_s1  ;;  %p297_p2 = scmp.lt.s32.totalorder %s291_s1, %s291_s1 }
   0xc   :  { %v216_v36 = vld [vmem:[%s438_s4] ss:$0 sm:$0xff] }
   0xd   :  { %p298_p3 = por %p297_p2, %p296_p1 }
   0xe   :  { %258 = vmatpush3.xpose.msk.msra.mxu0 %vm22_vm0, %v67_v8 }
   0xf   :  { %259 = vmatprep.subr.mxu0 %v313_v4  ;;  %p299_p4 = pnand %p298_p3, %p292_p0 }
  0x12   :  { %260 = vmatpush3.xpose.msk.msra.mxu0 %vm22_vm0, %v66_v9 }
  0x13   :  { %261 = vmatprep.subr.mxu0 %v313_v4 }
  0x16   :  { %262 = vmatpush3.xpose.msk.msra.mxu0 %vm22_vm0, %v65_v10 }
  0x17   :  { %263 = vmatprep.subr.mxu0 %v313_v4 }
  0x1a   :  { %264 = vmatpush3.xpose.msk.msra.mxu0 %vm22_vm0, %v64_v11 }
  0x1b   :  { %265 = vmatprep.subr.mxu0 %v313_v4 }
  0x1e   :  { %266 = vmatpush3.xpose.msk.msra.mxu0 %vm22_vm0, %v63_v12 }
  0x1f   :  { %267 = vmatprep.subr.mxu0 %v313_v4 }
  0x22   :  { %268 = vmatpush3.xpose.msk.msra.mxu0 %vm22_vm0, %v62_v13 }
  0x23   :  { %269 = vmatprep.subr.mxu0 %v313_v4 }
  0x26   :  { %270 = vmatpush3.xpose.msk.msra.mxu0 %vm22_vm0, %v61_v14 }
  0x27   :  { %271 = vmatprep.subr.mxu0 %v313_v4 }
  0x2a   :  { %272 = vmatpush3.xpose.msk.msra.mxu0 %vm22_vm0, %v60_v15 }
  0x2b   :  { %273 = vmatprep.subr.mxu0 %v313_v4 }
  0x2e   :  { %274 = vmatpush3.xpose.msk.msra.mxu0 %vm22_vm0, %v59_v16 }
  0x2f   :  { %275 = vmatprep.subr.mxu0 %v313_v4 }
  0x32   :  { %276 = vmatpush3.xpose.msk.msra.mxu0 %vm22_vm0, %v58_v17 }
  0x33   :  { %277 = vmatprep.subr.mxu0 %v313_v4 }
  0x36   :  { %278 = vmatpush3.xpose.msk.msra.mxu0 %vm22_vm0, %v57_v18 }
  0x37   :  { %279 = vmatprep.subr.mxu0 %v313_v4 }
  0x3a   :  { %280 = vmatpush3.xpose.msk.msra.mxu0 %vm22_vm0, %v56_v19 }
  0x3b   :  { %281 = vmatprep.subr.mxu0 %v313_v4 }
  0x3e   :  { %282 = vmatpush3.xpose.msk.msra.mxu0 %vm22_vm0, %v55_v20 }
  0x8c   :  { %v25_v21 = vpop.xlane.xlu0 %24 }
  0x8d   :  { %v30_v22 = vmul.f32 0.03125, %v25_v21 }
  0x8f   :  { %v32_v24 = vmul.f32 %v30_v22, %v30_v22  ;;  %v37_v29 = vsub.f32 %v349_v0, %v30_v22 }
  0x90   :  { %v29_v23 = vpop.xlane.xlu0 %28 }
  0x91   :  { %v31_v25 = vmul.f32 0.03125, %v29_v23 }
  0x93   :  { %v33_v26 = vsub.f32 %v31_v25, %v32_v24 }
  0x95   :  { %v34_v27 = vmax.f32 %v33_v26, 0.0 }
  0x97   :  { %v35_v28 = vadd.f32 1e-05, %v34_v27 }
  0x99   :  { %289 = vrsqrt.f32 %v35_v28 }
  0xa6   :  { %v290_v30 = vpop.eup %289 }
  0xa7   :  { %v38_v32 = vmul.f32 %v290_v30, %v37_v29 }
  0xa9   :  { %v46_v34 = vmul.f32 %v214_v31, %v38_v32 }
  0xab   :  { %v54_v35 = vadd.f32 %v215_v33, %v46_v34 }
  0xad   :  { %284 = vmatmul.mubr.msk.f32.vlgmr.msra.gmra.mxu0 %vm22_vm0, %v54_v35 }
 0x16d   :  { %v195_v37 = vpop.f32.mrf.mxu0 }
 0x16e   :  { %v196_v38 = vadd.f32 %v216_v36, %v195_v37 }
 0x16f   :  { %v285_v39 = vpop.f32.mrf.mxu0 }
 0x170   :  { %199 = vst [vmem:[#allocation2] sm:$0xff] %v196_v38 }
 0x171   :  { %302 = shalt.err (!%p299_p4)
}
 0x172   :  { %209 = dma.vmem_to_hbm [thread:$0]  %s207_s6, 128, %s439_s5, [#allocation3]  }
 0x173   :  { %311 = dma.done.wait [#allocation3], 128  }
 0x174   :  { %312 = vsyncadd [#allocation3], 4294967168 }
 0x175   :  { %213 = vsyncpa [#allocation3], 1 }

</bundles_post_ra>
